<compile_context>
chip_gen: v7x
topology: tpu7x:2x2x1
jax: 0.10.0
libtpu: 0.0.40
codegen_flags: <defaults>
</compile_context>

<pallas_src>
import functools
import math

import jax
import jax.numpy as jnp
from jax.experimental import pallas as pl
from jax.experimental.pallas import tpu as pltpu

LOG_STD_MAX = 2.0
LOG_STD_MIN = -20.0
_LOG2 = math.log(2.0)
_HALF_LOG_2PI = 0.5 * math.log(2.0 * math.pi)


def _round_up(x, m):
    return ((x + m - 1) // m) * m


def _pad2(x, rows, cols):
    return jnp.pad(x, ((0, rows - x.shape[0]), (0, cols - x.shape[1])))


def actor_kernel(actlim_ref, obs_ref, eps_ref,
                 w1_ref, b1_ref, w2_ref, b2_ref,
                 wh_ref, bh_ref,
                 act_ref, logp_ref, *, act_dim, act_pad):
    obs = obs_ref[...]

    # net: Linear -> ReLU -> Linear -> ReLU  (output_activation == activation)
    h = jnp.dot(obs, w1_ref[...], preferred_element_type=jnp.float32) + b1_ref[...]
    h = jnp.maximum(h, 0.0)
    h = jnp.dot(h, w2_ref[...], preferred_element_type=jnp.float32) + b2_ref[...]
    h = jnp.maximum(h, 0.0)

    # fused heads: one matmul; mu in lanes [0:act_pad), log_std in [act_pad:2*act_pad)
    head = jnp.dot(h, wh_ref[...], preferred_element_type=jnp.float32) + bh_ref[...]
    mu = head[:, :act_pad]
    log_std = jnp.clip(head[:, act_pad:], LOG_STD_MIN, LOG_STD_MAX)
    std = jnp.exp(log_std)

    # rsample: mu + std * eps
    eps = eps_ref[...]
    pi_action = mu + std * eps

    # Normal log_prob: (pi - mu)/std == eps exactly -> no divide needed.
    # tanh-squash correction: 2*(log2 - a - softplus(-2a)).
    corr = 2.0 * (_LOG2 - pi_action - jax.nn.softplus(-2.0 * pi_action))
    per_elem = -0.5 * eps * eps - log_std - _HALF_LOG_2PI - corr

    # single masked cross-lane reduction (padded lanes contribute 0)
    lane = jax.lax.broadcasted_iota(jnp.int32, per_elem.shape, 1)
    per_elem = jnp.where(lane < act_dim, per_elem, 0.0)
    logp_ref[...] = jnp.sum(per_elem, axis=-1, keepdims=True)

    act_ref[...] = actlim_ref[0, 0] * jnp.tanh(pi_action)


def squashed_gaussian_actor(obs, eps, params, act_limit, *, block_b=256):
    B, obs_dim = obs.shape
    h1 = params["w1"].shape[1]
    h2 = params["w2"].shape[1]
    act_dim = params["wmu"].shape[1]

    # lane-dense (128-multiple) padded feature dims
    d_obs = _round_up(obs_dim, 128)
    d_h1 = _round_up(h1, 128)
    d_h2 = _round_up(h2, 128)
    a_pad = _round_up(act_dim, 128)

    # zero-padded weights ([in, out] layout) and fused heads
    w1 = _pad2(params["w1"], d_obs, d_h1)
    b1 = _pad2(params["b1"], 1, d_h1)
    w2 = _pad2(params["w2"], d_h1, d_h2)
    b2 = _pad2(params["b2"], 1, d_h2)
    wh = jnp.concatenate([_pad2(params["wmu"], d_h2, a_pad),
                          _pad2(params["wls"], d_h2, a_pad)], axis=1)
    bh = jnp.concatenate([_pad2(params["bmu"], 1, a_pad),
                          _pad2(params["bls"], 1, a_pad)], axis=1)

    # batch tiling (grid over batch; weights resident across steps)
    tb = min(block_b, _round_up(B, 8))
    b_pad = _round_up(B, tb)
    obs_p = jnp.pad(obs, ((0, b_pad - B), (0, d_obs - obs_dim)))
    eps_p = jnp.pad(eps, ((0, b_pad - B), (0, a_pad - act_dim)))
    actlim = jnp.full((1, 1), act_limit, jnp.float32)

    kernel = functools.partial(actor_kernel, act_dim=act_dim, act_pad=a_pad)

    def batch_spec(cols):
        return pl.BlockSpec((tb, cols), lambda i: (i, 0))

    def const_spec(arr):
        return pl.BlockSpec(arr.shape, lambda i: (0, 0))

    act_p, logp_p = pl.pallas_call(
        kernel,
        out_shape=(
            jax.ShapeDtypeStruct((b_pad, a_pad), jnp.float32),
            jax.ShapeDtypeStruct((b_pad, 1), jnp.float32),
        ),
        grid=(b_pad // tb,),
        in_specs=[
            pl.BlockSpec(memory_space=pltpu.MemorySpace.SMEM),  # act_limit scalar
            batch_spec(d_obs),          # obs
            batch_spec(a_pad),          # eps
            const_spec(w1), const_spec(b1),
            const_spec(w2), const_spec(b2),
            const_spec(wh), const_spec(bh),
        ],
        out_specs=(
            batch_spec(a_pad),
            pl.BlockSpec((tb, 1), lambda i: (i, 0)),
        ),
        compiler_params=pltpu.CompilerParams(dimension_semantics=("parallel",)),
    )(actlim, obs_p, eps_p, w1, b1, w2, b2, wh, bh)

    return act_p[:B, :act_dim], logp_p[:B, 0]


def init_params(key, obs_dim, hidden_sizes, act_dim):
    """Deterministic synthetic parameters; weights are [in, out]."""
    sizes = [obs_dim] + list(hidden_sizes)
    params = {}
    keys = jax.random.split(key, 8)
    params["w1"] = 0.1 * jax.random.normal(keys[0], (sizes[0], sizes[1]), jnp.float32)
    params["b1"] = 0.1 * jax.random.normal(keys[1], (1, sizes[1]), jnp.float32)
    params["w2"] = 0.1 * jax.random.normal(keys[2], (sizes[1], sizes[2]), jnp.float32)
    params["b2"] = 0.1 * jax.random.normal(keys[3], (1, sizes[2]), jnp.float32)
    params["wmu"] = 0.1 * jax.random.normal(keys[4], (sizes[2], act_dim), jnp.float32)
    params["bmu"] = 0.1 * jax.random.normal(keys[5], (1, act_dim), jnp.float32)
    params["wls"] = 0.1 * jax.random.normal(keys[6], (sizes[2], act_dim), jnp.float32)
    params["bls"] = 0.1 * jax.random.normal(keys[7], (1, act_dim), jnp.float32)
    return params


def reference_forward(obs, eps, params, act_limit):
    h = jnp.maximum(obs @ params["w1"] + params["b1"], 0.0)
    h = jnp.maximum(h @ params["w2"] + params["b2"], 0.0)
    mu = h @ params["wmu"] + params["bmu"]
    log_std = jnp.clip(h @ params["wls"] + params["bls"], LOG_STD_MIN, LOG_STD_MAX)
    std = jnp.exp(log_std)
    pi = mu + std * eps
    logp = jnp.sum(-0.5 * ((pi - mu) / std) ** 2 - log_std - _HALF_LOG_2PI, axis=-1)
    logp -= jnp.sum(2.0 * (_LOG2 - pi - jax.nn.softplus(-2.0 * pi)), axis=-1)
    return act_limit * jnp.tanh(pi), logp


if __name__ == "__main__":
    # Small shapes consistent with the module: obs [B, obs_dim]
    B, OBS_DIM, ACT_DIM = 8, 32, 8
    HIDDEN = (64, 64)
    ACT_LIMIT = 1.0

    root = jax.random.PRNGKey(0)
    k_params, k_obs, k_eps = jax.random.split(root, 3)

    params = init_params(k_params, OBS_DIM, HIDDEN, ACT_DIM)
    obs = jax.random.normal(k_obs, (B, OBS_DIM), jnp.float32)
    eps = jax.random.normal(k_eps, (B, ACT_DIM), jnp.float32)  # rsample noise

    pi_action, logp_pi = squashed_gaussian_actor(obs, eps, params, ACT_LIMIT)
    jax.block_until_ready((pi_action, logp_pi))

    # sanity check against a plain-JAX reference
    ref_a, ref_lp = reference_forward(obs, eps, params, ACT_LIMIT)
    assert pi_action.shape == (B, ACT_DIM) and logp_pi.shape == (B,)
    assert jnp.allclose(pi_action, ref_a, atol=1e-5, rtol=1e-5)
    assert jnp.allclose(logp_pi, ref_lp, atol=1e-4, rtol=1e-4)

    print("KERNEL_OK")
</pallas_src>

<mosaic_0001>
module attributes {stable_mosaic.version = 11 : i64} {
  func.func @actor_kernel(%arg0: i32, %arg1: memref<1x1xf32, #tpu.memory_space<smem>>, %arg2: memref<8x128xf32, #tpu.memory_space<vmem>>, %arg3: memref<8x128xf32, #tpu.memory_space<vmem>>, %arg4: memref<128x128xf32, #tpu.memory_space<vmem>>, %arg5: memref<1x128xf32, #tpu.memory_space<vmem>>, %arg6: memref<128x128xf32, #tpu.memory_space<vmem>>, %arg7: memref<1x128xf32, #tpu.memory_space<vmem>>, %arg8: memref<128x256xf32, #tpu.memory_space<vmem>>, %arg9: memref<1x256xf32, #tpu.memory_space<vmem>>, %arg10: memref<8x128xf32, #tpu.memory_space<vmem>>, %arg11: memref<8x1xf32, #tpu.memory_space<vmem>>) attributes {dimension_semantics = [#tpu.dimension_semantics<parallel>], iteration_bounds = array<i64: 1>, scalar_prefetch = 0 : i64, scratch_operands = 0 : i64, tpu.core_type = #tpu.core_type<tc>, window_params = [{transform_indices = @transform_0, window_bounds = array<i64: 1, 1>}, {transform_indices = @transform_1, window_bounds = array<i64: 8, 128>}, {transform_indices = @transform_2, window_bounds = array<i64: 8, 128>}, {pipeline_mode = #tpu.pipeline_mode<synchronous>, transform_indices = @transform_3, window_bounds = array<i64: 128, 128>}, {pipeline_mode = #tpu.pipeline_mode<synchronous>, transform_indices = @transform_4, window_bounds = array<i64: 1, 128>}, {pipeline_mode = #tpu.pipeline_mode<synchronous>, transform_indices = @transform_5, window_bounds = array<i64: 128, 128>}, {pipeline_mode = #tpu.pipeline_mode<synchronous>, transform_indices = @transform_6, window_bounds = array<i64: 1, 128>}, {pipeline_mode = #tpu.pipeline_mode<synchronous>, transform_indices = @transform_7, window_bounds = array<i64: 128, 256>}, {pipeline_mode = #tpu.pipeline_mode<synchronous>, transform_indices = @transform_8, window_bounds = array<i64: 1, 256>}, {transform_indices = @transform_9, window_bounds = array<i64: 8, 128>}, {transform_indices = @transform_10, window_bounds = array<i64: 8, 1>}]} {
    %c0 = arith.constant 0 : index
    %c0_0 = arith.constant 0 : index
    %0 = vector.load %arg2[%c0, %c0_0] : memref<8x128xf32, #tpu.memory_space<vmem>>, vector<8x128xf32>
    %c0_1 = arith.constant 0 : index
    %c0_2 = arith.constant 0 : index
    %1 = vector.load %arg4[%c0_1, %c0_2] : memref<128x128xf32, #tpu.memory_space<vmem>>, vector<128x128xf32>
    %cst = arith.constant dense<0.000000e+00> : vector<8x128xf32>
    %2 = tpu.matmul %0, %1, %cst {dimension_numbers = #tpu.dot_dimension_numbers<[1], [0], [0], [1], [0, 0, 1, 1], [], []>} : vector<8x128xf32>, vector<128x128xf32>, vector<8x128xf32> -> vector<8x128xf32>
    %c0_3 = arith.constant 0 : index
    %c0_4 = arith.constant 0 : index
    %3 = vector.load %arg5[%c0_3, %c0_4] : memref<1x128xf32, #tpu.memory_space<vmem>>, vector<1x128xf32>
    %4 = vector.broadcast %3 : vector<1x128xf32> to vector<8x128xf32>
    %5 = arith.addf %2, %4 : vector<8x128xf32>
    %cst_5 = arith.constant 0.000000e+00 : f32
    %6 = vector.broadcast %cst_5 : f32 to vector<8x128xf32>
    %7 = arith.maximumf %5, %6 : vector<8x128xf32>
    %c0_6 = arith.constant 0 : index
    %c0_7 = arith.constant 0 : index
    %8 = vector.load %arg6[%c0_6, %c0_7] : memref<128x128xf32, #tpu.memory_space<vmem>>, vector<128x128xf32>
    %cst_8 = arith.constant dense<0.000000e+00> : vector<8x128xf32>
    %9 = tpu.matmul %7, %8, %cst_8 {dimension_numbers = #tpu.dot_dimension_numbers<[1], [0], [0], [1], [0, 0, 1, 1], [], []>} : vector<8x128xf32>, vector<128x128xf32>, vector<8x128xf32> -> vector<8x128xf32>
    %c0_9 = arith.constant 0 : index
    %c0_10 = arith.constant 0 : index
    %10 = vector.load %arg7[%c0_9, %c0_10] : memref<1x128xf32, #tpu.memory_space<vmem>>, vector<1x128xf32>
    %11 = vector.broadcast %10 : vector<1x128xf32> to vector<8x128xf32>
    %12 = arith.addf %9, %11 : vector<8x128xf32>
    %cst_11 = arith.constant 0.000000e+00 : f32
    %13 = vector.broadcast %cst_11 : f32 to vector<8x128xf32>
    %14 = arith.maximumf %12, %13 : vector<8x128xf32>
    %c0_12 = arith.constant 0 : index
    %c0_13 = arith.constant 0 : index
    %15 = vector.load %arg8[%c0_12, %c0_13] : memref<128x256xf32, #tpu.memory_space<vmem>>, vector<128x256xf32>
    %cst_14 = arith.constant dense<0.000000e+00> : vector<8x256xf32>
    %16 = tpu.matmul %14, %15, %cst_14 {dimension_numbers = #tpu.dot_dimension_numbers<[1], [0], [0], [1], [0, 0, 1, 1], [], []>} : vector<8x128xf32>, vector<128x256xf32>, vector<8x256xf32> -> vector<8x256xf32>
    %c0_15 = arith.constant 0 : index
    %c0_16 = arith.constant 0 : index
    %17 = vector.load %arg9[%c0_15, %c0_16] : memref<1x256xf32, #tpu.memory_space<vmem>>, vector<1x256xf32>
    %18 = vector.broadcast %17 : vector<1x256xf32> to vector<8x256xf32>
    %19 = arith.addf %16, %18 : vector<8x256xf32>
    %20 = vector.extract_strided_slice %19 {offsets = [0, 0], sizes = [8, 128], strides = [1, 1]} : vector<8x256xf32> to vector<8x128xf32>
    %21 = vector.extract_strided_slice %19 {offsets = [0, 128], sizes = [8, 128], strides = [1, 1]} : vector<8x256xf32> to vector<8x128xf32>
    %cst_17 = arith.constant -2.000000e+01 : f32
    %cst_18 = arith.constant 2.000000e+00 : f32
    %22 = vector.broadcast %cst_17 : f32 to vector<8x128xf32>
    %23 = arith.maximumf %22, %21 : vector<8x128xf32>
    %24 = vector.broadcast %cst_18 : f32 to vector<8x128xf32>
    %25 = arith.minimumf %24, %23 : vector<8x128xf32>
    %26 = math.exp %25 : vector<8x128xf32>
    %c0_19 = arith.constant 0 : index
    %c0_20 = arith.constant 0 : index
    %27 = vector.load %arg3[%c0_19, %c0_20] : memref<8x128xf32, #tpu.memory_space<vmem>>, vector<8x128xf32>
    %28 = arith.mulf %26, %27 : vector<8x128xf32>
    %29 = arith.addf %20, %28 : vector<8x128xf32>
    %cst_21 = arith.constant 0.693147182 : f32
    %30 = vector.broadcast %cst_21 : f32 to vector<8x128xf32>
    %31 = arith.subf %30, %29 : vector<8x128xf32>
    %cst_22 = arith.constant -2.000000e+00 : f32
    %32 = vector.broadcast %cst_22 : f32 to vector<8x128xf32>
    %33 = arith.mulf %32, %29 : vector<8x128xf32>
    %cst_23 = arith.constant 0.000000e+00 : f32
    %34 = vector.broadcast %cst_23 : f32 to vector<8x128xf32>
    %35 = arith.maximumf %33, %34 : vector<8x128xf32>
    %36 = vector.broadcast %cst_23 : f32 to vector<8x128xf32>
    %37 = arith.subf %33, %36 : vector<8x128xf32>
    %38 = arith.cmpf one, %37, %37 : vector<8x128xf32>
    %39 = vector.broadcast %cst_23 : f32 to vector<8x128xf32>
    %40 = arith.addf %33, %39 : vector<8x128xf32>
    %41 = math.absf %37 : vector<8x128xf32>
    %cst_24 = arith.constant 0.000000e+00 : f32
    %42 = vector.broadcast %cst_24 : f32 to vector<8x128xf32>
    %43 = arith.subf %42, %41 : vector<8x128xf32>
    %44 = math.exp %43 : vector<8x128xf32>
    %45 = math.log1p %44 : vector<8x128xf32>
    %46 = arith.addf %35, %45 : vector<8x128xf32>
    %47 = arith.select %38, %40, %46 : vector<8x128xi1>, vector<8x128xf32>
    %48 = arith.subf %31, %47 : vector<8x128xf32>
    %cst_25 = arith.constant 2.000000e+00 : f32
    %49 = vector.broadcast %cst_25 : f32 to vector<8x128xf32>
    %50 = arith.mulf %49, %48 : vector<8x128xf32>
    %cst_26 = arith.constant -5.000000e-01 : f32
    %51 = vector.broadcast %cst_26 : f32 to vector<8x128xf32>
    %52 = arith.mulf %51, %27 : vector<8x128xf32>
    %53 = arith.mulf %52, %27 : vector<8x128xf32>
    %54 = arith.subf %53, %25 : vector<8x128xf32>
    %cst_27 = arith.constant 0.918938517 : f32
    %55 = vector.broadcast %cst_27 : f32 to vector<8x128xf32>
    %56 = arith.subf %54, %55 : vector<8x128xf32>
    %57 = arith.subf %56, %50 : vector<8x128xf32>
    %58 = tpu.iota {dimensions = array<i32: 1>} : vector<8x128xi32>
    %c8_i32 = arith.constant 8 : i32
    %59 = vector.broadcast %c8_i32 : i32 to vector<8x128xi32>
    %60 = arith.cmpi slt, %58, %59 : vector<8x128xi32>
    %cst_28 = arith.constant 0.000000e+00 : f32
    %61 = vector.broadcast %cst_28 : f32 to vector<8x128xf32>
    %62 = arith.select %60, %57, %61 : vector<8x128xi1>, vector<8x128xf32>
    %cst_29 = arith.constant dense<0.000000e+00> : vector<8xf32>
    %63 = vector.multi_reduction <add>, %62, %cst_29 [1] : vector<8x128xf32> to vector<8xf32>
    %64 = vector.shape_cast %63 : vector<8xf32> to vector<8x1xf32>
    %c0_30 = arith.constant 0 : index
    %c0_31 = arith.constant 0 : index
    %65 = vector.load %arg11[%c0_30, %c0_31] : memref<8x1xf32, #tpu.memory_space<vmem>>, vector<8x1xf32>
    tpu.vector_store %arg11[%c0_30, %c0_31], %64 {strides = array<i32>} : memref<8x1xf32, #tpu.memory_space<vmem>>, vector<8x1xf32>,
    %c0_32 = arith.constant 0 : index
    %c0_33 = arith.constant 0 : index
    %66 = memref.load %arg1[%c0_32, %c0_33] : memref<1x1xf32, #tpu.memory_space<smem>>
    %67 = math.tanh %29 : vector<8x128xf32>
    %68 = vector.broadcast %66 : f32 to vector<8x128xf32>
    %69 = arith.mulf %68, %67 : vector<8x128xf32>
    %c0_34 = arith.constant 0 : index
    %c0_35 = arith.constant 0 : index
    %70 = vector.load %arg10[%c0_34, %c0_35] : memref<8x128xf32, #tpu.memory_space<vmem>>, vector<8x128xf32>
    tpu.vector_store %arg10[%c0_34, %c0_35], %69 {strides = array<i32>} : memref<8x128xf32, #tpu.memory_space<vmem>>, vector<8x128xf32>,
    return
  }
  func.func @transform_0(%arg0: i32) -> (i32, i32) {
    %c0_i32 = arith.constant 0 : i32
    %c0_i32_0 = arith.constant 0 : i32
    %c0_i32_1 = arith.constant 0 : i32
    return %c0_i32, %c0_i32_0 : i32, i32
  }
  func.func @transform_1(%arg0: i32) -> (i32, i32) {
    %c0_i32 = arith.constant 0 : i32
    %c0_i32_0 = arith.constant 0 : i32
    return %arg0, %c0_i32 : i32, i32
  }
  func.func @transform_2(%arg0: i32) -> (i32, i32) {
    %c0_i32 = arith.constant 0 : i32
    %c0_i32_0 = arith.constant 0 : i32
    return %arg0, %c0_i32 : i32, i32
  }
  func.func @transform_3(%arg0: i32) -> (i32, i32) {
    %c0_i32 = arith.constant 0 : i32
    %c0_i32_0 = arith.constant 0 : i32
    %c0_i32_1 = arith.constant 0 : i32
    return %c0_i32, %c0_i32_0 : i32, i32
  }
  func.func @transform_4(%arg0: i32) -> (i32, i32) {
    %c0_i32 = arith.constant 0 : i32
    %c0_i32_0 = arith.constant 0 : i32
    %c0_i32_1 = arith.constant 0 : i32
    return %c0_i32, %c0_i32_0 : i32, i32
  }
  func.func @transform_5(%arg0: i32) -> (i32, i32) {
    %c0_i32 = arith.constant 0 : i32
    %c0_i32_0 = arith.constant 0 : i32
    %c0_i32_1 = arith.constant 0 : i32
    return %c0_i32, %c0_i32_0 : i32, i32
  }
  func.func @transform_6(%arg0: i32) -> (i32, i32) {
    %c0_i32 = arith.constant 0 : i32
    %c0_i32_0 = arith.constant 0 : i32
    %c0_i32_1 = arith.constant 0 : i32
    return %c0_i32, %c0_i32_0 : i32, i32
  }
  func.func @transform_7(%arg0: i32) -> (i32, i32) {
    %c0_i32 = arith.constant 0 : i32
    %c0_i32_0 = arith.constant 0 : i32
    %c0_i32_1 = arith.constant 0 : i32
    return %c0_i32, %c0_i32_0 : i32, i32
  }
  func.func @transform_8(%arg0: i32) -> (i32, i32) {
    %c0_i32 = arith.constant 0 : i32
    %c0_i32_0 = arith.constant 0 : i32
    %c0_i32_1 = arith.constant 0 : i32
    return %c0_i32, %c0_i32_0 : i32, i32
  }
  func.func @transform_9(%arg0: i32) -> (i32, i32) {
    %c0_i32 = arith.constant 0 : i32
    %c0_i32_0 = arith.constant 0 : i32
    return %arg0, %c0_i32 : i32, i32
  }
  func.func @transform_10(%arg0: i32) -> (i32, i32) {
    %c0_i32 = arith.constant 0 : i32
    %c0_i32_0 = arith.constant 0 : i32
    return %arg0, %c0_i32 : i32, i32
  }
}

</mosaic_0001>

<bundles_post_ra>
// kernel: tpu_custom_call.1
= control target key start
LH: loop header
LB: loop body
LE: loop exit
PB: predicated region body
PF: predicated region fallthrough
CT: control target
= control target key end

     0   :  { %17 = vsyncpa [#allocation4], 0  ;;  %s1000_s0 = inlined_call_operand.<no memory space> [shape: f32[1,1], index: 0, kind: input, shape index: {}]   ;;  %s1001_s1 = inlined_call_operand.hbm [shape: f32[8,128], index: 1, kind: input, shape index: {}]   ;;  %s1002_s2 = inlined_call_operand.hbm [shape: f32[8,128], index: 2, kind: input, shape index: {}]   ;;  %s1003_s3 = inlined_call_operand.hbm [shape: f32[128,128], index: 3, kind: input, shape index: {}]   ;;  %s1004_s4 = inlined_call_operand.vmem [shape: f32[1,128], index: 4, kind: input, shape index: {}]   ;;  %s1005_s5 = inlined_call_operand.hbm [shape: f32[128,128], index: 5, kind: input, shape index: {}]   ;;  %s1006_s6 = inlined_call_operand.vmem [shape: f32[1,128], index: 6, kind: input, shape index: {}]   ;;  %s1007_s7 = inlined_call_operand.hbm [shape: f32[128,256], index: 7, kind: input, shape index: {}]   ;;  %s1008_s8 = inlined_call_operand.vmem [shape: f32[1,256], index: 8, kind: input, shape index: {}]   ;;  %s1009_s9 = inlined_call_operand.hbm [shape: f32[8,128], index: 9, kind: output, shape index: {0}]   ;;  %s1010_s10 = inlined_call_operand.vmem [shape: f32[8,1], index: 10, kind: output, shape index: {1}]  }
   0x1   :  { %18 = vsyncpa [#allocation7], 0 }
   0x2   :  { %19 = vsyncpa [#allocation10], 0 }
   0x3   :  { %20 = vsyncpa [#allocation5], 0  ;;  %s820_s13 = smov [#allocation6]   ;;  %s680_s17 = scalar_lea.hbm %s1002_s2, 128 }
   0x4   :  { %s39_s14 = sshll.u32 %s820_s13, 4  ;;  %p681_p0 = scmp.ne.s32.totalorder %s1002_s2, %s680_s17  ;;  %s40_s14 = int_to_ptr.vmem [resolvable:$true] %s39_s14 }
   0x5   :  { %p684_p1 = scmp.lt.u32.totalorder %s680_s17, %s1002_s2 }
   0x7   :  { %p686_p2 = pnand %p684_p1, %p681_p0 }
   0x9   :  { %689 = shalt.err (!%p686_p2)
}
   0xa   :  { %s690_s22 = scalar_lea.vmem %s40_s14, 128  ;;  %p695_p4 = scmp.lt.s32.totalorder %s40_s14, %s40_s14 }
   0xb   :  { %p691_p3 = scmp.ne.s32.totalorder %s40_s14, %s690_s22  ;;  %p696_p5 = scmp.lt.s32.totalorder %s690_s22, %s690_s22 }
   0xd   :  { %p697_p6 = por %p696_p5, %p695_p4 }
   0xf   :  { %p698_p7 = pnand %p697_p6, %p691_p3 }
  0x11   :  { %701 = shalt.err (!%p698_p7)
}
  0x12   :  { %42 = dma.hbm_to_vmem [thread:$0]  %s1002_s2, 128, %s40_s14, [#allocation7]  }
  0x13   :  { %s821_s25 = smov [#allocation9]   ;;  %s822_s27 = smov [#allocation3]  }
  0x14   :  { %s62_s26 = sshll.u32 %s821_s25, 4  ;;  %s29_s28 = sshll.u32 %s822_s27, 4  ;;  %s63_s26 = int_to_ptr.vmem [resolvable:$true] %s62_s26  ;;  %s30_s28 = int_to_ptr.vmem [resolvable:$true] %s29_s28 }
  0x15   :  { %s702_s11 = scalar_lea.hbm %s1005_s5, 2048 }
  0x16   :  { %p703_p8 = scmp.ne.s32.totalorder %s1005_s5, %s702_s11  ;;  %p706_p9 = scmp.lt.u32.totalorder %s702_s11, %s1005_s5 }
  0x18   :  { %p708_p10 = pnand %p706_p9, %p703_p8 }
  0x1a   :  { %711 = shalt.err (!%p708_p10)
}
  0x1b   :  { %s712_s2 = scalar_lea.vmem %s63_s26, 2048  ;;  %p717_p12 = scmp.lt.s32.totalorder %s63_s26, %s63_s26 }
  0x1c   :  { %p713_p11 = scmp.ne.s32.totalorder %s63_s26, %s712_s2  ;;  %p718_p13 = scmp.lt.s32.totalorder %s712_s2, %s712_s2 }
  0x1e   :  { %p719_p0 = por %p718_p13, %p717_p12 }
  0x20   :  { %p720_p1 = pnand %p719_p0, %p713_p11 }
  0x22   :  { %723 = shalt.err (!%p720_p1)
}
  0x23   :  { %s823_s14 = smov 128   ;;  %s824_s17 = smov 8  }
  0x24   :  { %68 = dma.hbm_to_vmem [thread:$0]  %s1005_s5, 2048, %s63_s26, [#allocation10], %s823_s14, %s823_s14, %s824_s17  }
  0x25   :  { %s724_s22 = scalar_lea.hbm %s1001_s1, 128 }
  0x26   :  { %p725_p2 = scmp.ne.s32.totalorder %s1001_s1, %s724_s22  ;;  %p728_p3 = scmp.lt.u32.totalorder %s724_s22, %s1001_s1 }
  0x28   :  { %p730_p4 = pnand %p728_p3, %p725_p2 }
  0x2a   :  { %733 = shalt.err (!%p730_p4)
}
  0x2b   :  { %s734_s29 = scalar_lea.vmem %s30_s28, 128  ;;  %p739_p6 = scmp.lt.s32.totalorder %s30_s28, %s30_s28 }
  0x2c   :  { %p735_p5 = scmp.ne.s32.totalorder %s30_s28, %s734_s29  ;;  %p740_p7 = scmp.lt.s32.totalorder %s734_s29, %s734_s29 }
  0x2e   :  { %p741_p8 = por %p740_p7, %p739_p6 }
  0x30   :  { %p742_p9 = pnand %p741_p8, %p735_p5 }
  0x32   :  { %745 = shalt.err (!%p742_p9)
}
  0x33   :  { %32 = dma.hbm_to_vmem [thread:$0]  %s1001_s1, 128, %s30_s28, [#allocation4]  }
  0x34   :  { %s825_s30 = smov [#allocation8]   ;;  %s826_s12 = smov [#allocation11]  }
  0x35   :  { %s48_s11 = sshll.u32 %s825_s30, 4  ;;  %s76_s13 = sshll.u32 %s826_s12, 4  ;;  %s49_s11 = int_to_ptr.vmem [resolvable:$true] %s48_s11  ;;  %s77_s13 = int_to_ptr.vmem [resolvable:$true] %s76_s13 }
  0x36   :  { %s746_s2 = scalar_lea.hbm %s1003_s3, 2048 }
  0x37   :  { %p747_p10 = scmp.ne.s32.totalorder %s1003_s3, %s746_s2  ;;  %p750_p11 = scmp.lt.u32.totalorder %s746_s2, %s1003_s3 }
  0x39   :  { %p752_p12 = pnand %p750_p11, %p747_p10 }
  0x3b   :  { %755 = shalt.err (!%p752_p12)
}
  0x3c   :  { %s756_s1 = scalar_lea.vmem %s49_s11, 2048  ;;  %p761_p0 = scmp.lt.s32.totalorder %s49_s11, %s49_s11 }
  0x3d   :  { %p757_p13 = scmp.ne.s32.totalorder %s49_s11, %s756_s1  ;;  %p762_p1 = scmp.lt.s32.totalorder %s756_s1, %s756_s1 }
  0x3f   :  { %p763_p2 = por %p762_p1, %p761_p0 }
  0x41   :  { %p764_p3 = pnand %p763_p2, %p757_p13 }
  0x43   :  { %767 = shalt.err (!%p764_p3)
}
  0x44   :  { %54 = dma.hbm_to_vmem [thread:$0]  %s1003_s3, 2048, %s49_s11, [#allocation7], %s823_s14, %s823_s14, %s824_s17  }
  0x45   :  { %s768_s25 = scalar_lea.hbm %s1007_s7, 4096 }
  0x46   :  { %p769_p4 = scmp.ne.s32.totalorder %s1007_s7, %s768_s25  ;;  %p772_p5 = scmp.lt.u32.totalorder %s768_s25, %s1007_s7 }
  0x48   :  { %p774_p6 = pnand %p772_p5, %p769_p4 }
  0x4a   :  { %777 = shalt.err (!%p774_p6)
}
  0x4b   :  { %s778_s30 = scalar_lea.vmem %s77_s13, 4096  ;;  %p783_p8 = scmp.lt.s32.totalorder %s77_s13, %s77_s13 }
  0x4c   :  { %p779_p7 = scmp.ne.s32.totalorder %s77_s13, %s778_s30  ;;  %p784_p9 = scmp.lt.s32.totalorder %s778_s30, %s778_s30 }
  0x4e   :  { %p785_p10 = por %p784_p9, %p783_p8 }
  0x50   :  { %p786_p11 = pnand %p785_p10, %p779_p7 }
  0x52   :  { %789 = shalt.err (!%p786_p11)
}
  0x53   :  { %s827_s3 = smov 256   ;;  %s828_s14 = smov 16  }
  0x54   :  { %82 = dma.hbm_to_vmem [thread:$0]  %s1007_s7, 4096, %s77_s13, [#allocation10], %s827_s3, %s827_s3, %s828_s14  }
  0x55   :  { %812 = dma.done.wait [#allocation4], 128  }
  0x56   :  { %813 = vsyncadd [#allocation4], 4294967168 }
  0x57   :  { %814 = dma.done.wait [#allocation7], 2176  }
  0x58   :  { %815 = vsyncadd [#allocation7], 4294965120 }
  0x59   :  { %816 = dma.done.wait [#allocation10], 6144  }
  0x5a   :  { %817 = vsyncadd [#allocation10], 4294961152  ;;  %v829_v0 = vmov 0.0|0.0   ;;  %vm830_vm0 = vmmov 0   ;;  %v831_v1 = vmov 0.0   ;;  %v101_v2 = vld [vmem:[#allocation8] sm:$0xff] }
  0x5b   :  { %579 = vmatprep.subr.bf16.mxu0 %v829_v0  ;;  %541 = vmatprep.mubr.msk.f32.mxu0 %vm830_vm0, %v831_v1  ;;  %v102_v3 = vld [vmem:[#allocation8 + $0x8] sm:$0xff]  ;;  %v103_v4 = vld [vmem:[#allocation8 + $0x10] sm:$0xff]  ;;  %v104_v6 = vld [vmem:[#allocation8 + $0x18] sm:$0xff] }
  0x5c   :  { %603 = vmatprep.subr.bf16.mxu1 %v829_v0  ;;  %576 = vmatprep.mubr.msk.f32.mxu1 %vm830_vm0, %v831_v1  ;;  %v580_v5 = vpack.c.bf16 %v102_v3, %v101_v2  ;;  %v583_v7 = vpack.c.bf16 %v104_v6, %v103_v4  ;;  %v105_v8 = vld [vmem:[#allocation8 + $0x20] sm:$0xff]  ;;  %v106_v9 = vld [vmem:[#allocation8 + $0x28] sm:$0xff]  ;;  %v197_v12 = vld [vmem:[#allocation9 + $0x10] sm:$0xff] }
  0x5d   :  { %v195_v10 = vld [vmem:[#allocation9] sm:$0xff]  ;;  %v196_v11 = vld [vmem:[#allocation9 + $0x8] sm:$0xff]  ;;  %v198_v13 = vld [vmem:[#allocation9 + $0x18] sm:$0xff]  ;;  %v586_v14 = vpack.c.bf16 %v106_v9, %v105_v8 }
  0x5e   :  { %581 = vmatpush3.bf16.msra.mxu0 %v580_v5  ;;  %v604_v15 = vpack.c.bf16 %v196_v11, %v195_v10  ;;  %v107_v16 = vld [vmem:[#allocation8 + $0x30] sm:$0xff]  ;;  %v108_v17 = vld [vmem:[#allocation8 + $0x38] sm:$0xff]  ;;  %v607_v18 = vpack.c.bf16 %v198_v13, %v197_v12  ;;  %v199_v19 = vld [vmem:[#allocation9 + $0x20] sm:$0xff] }
  0x5f   :  { %582 = vmatprep.subr.bf16.mxu0 %v829_v0  ;;  %v200_v20 = vld [vmem:[#allocation9 + $0x28] sm:$0xff]  ;;  %v589_v21 = vpack.c.bf16 %v108_v17, %v107_v16  ;;  %v109_v22 = vld [vmem:[#allocation8 + $0x40] sm:$0xff]  ;;  %v201_v25 = vld [vmem:[#allocation9 + $0x30] sm:$0xff] }
  0x60   :  { %605 = vmatpush3.bf16.msra.mxu1 %v604_v15  ;;  %v110_v23 = vld [vmem:[#allocation8 + $0x48] sm:$0xff]  ;;  %v610_v24 = vpack.c.bf16 %v200_v20, %v199_v19  ;;  %v202_v26 = vld [vmem:[#allocation9 + $0x38] sm:$0xff]  ;;  %v111_v28 = vld [vmem:[#allocation8 + $0x50] sm:$0xff] }
  0x61   :  { %606 = vmatprep.subr.bf16.mxu1 %v829_v0  ;;  %v592_v27 = vpack.c.bf16 %v110_v23, %v109_v22  ;;  %v112_v29 = vld [vmem:[#allocation8 + $0x58] sm:$0xff]  ;;  %v613_v30 = vpack.c.bf16 %v202_v26, %v201_v25  ;;  %v203_v31 = vld [vmem:[#allocation9 + $0x40] sm:$0xff]  ;;  %v204_v32 = vld [vmem:[#allocation9 + $0x48] sm:$0xff] }
  0x62   :  { %584 = vmatpush3.bf16.msra.mxu0 %v583_v7  ;;  %v595_v33 = vpack.c.bf16 %v112_v29, %v111_v28  ;;  %v113_v34 = vld [vmem:[#allocation8 + $0x60] sm:$0xff]  ;;  %v114_v35 = vld [vmem:[#allocation8 + $0x68] sm:$0xff]  ;;  %v616_v36 = vpack.c.bf16 %v204_v32, %v203_v31  ;;  %v205_v37 = vld [vmem:[#allocation9 + $0x50] sm:$0xff] }
  0x63   :  { %585 = vmatprep.subr.bf16.mxu0 %v829_v0  ;;  %v206_v38 = vld [vmem:[#allocation9 + $0x58] sm:$0xff]  ;;  %v598_v39 = vpack.c.bf16 %v114_v35, %v113_v34  ;;  %v115_v40 = vld [vmem:[#allocation8 + $0x70] sm:$0xff]  ;;  %v207_v43 = vld [vmem:[#allocation9 + $0x60] sm:$0xff] }
  0x64   :  { %608 = vmatpush3.bf16.msra.mxu1 %v607_v18  ;;  %v116_v41 = vld [vmem:[#allocation8 + $0x78] sm:$0xff]  ;;  %v619_v42 = vpack.c.bf16 %v206_v38, %v205_v37  ;;  %v208_v44 = vld [vmem:[#allocation9 + $0x68] sm:$0xff]  ;;  %v100_v47 = vld [vmem:[#allocation3] sm:$0xff] }
  0x65   :  { %609 = vmatprep.subr.bf16.mxu1 %v829_v0  ;;  %v601_v45 = vpack.c.bf16 %v116_v41, %v115_v40  ;;  %v622_v46 = vpack.c.bf16 %v208_v44, %v207_v43  ;;  %v209_v48 = vld [vmem:[#allocation9 + $0x70] sm:$0xff]  ;;  %v210_v49 = vld [vmem:[#allocation9 + $0x78] sm:$0xff]  ;;  %v290_v51 = vld [vmem:[#allocation11 + $0x8] sm:$0xff] }
  0x66   :  { %587 = vmatpush3.bf16.msra.mxu0 %v586_v14  ;;  %v625_v50 = vpack.c.bf16 %v210_v49, %v209_v48  ;;  %v292_v52 = vld [vmem:[#allocation11 + $0x18] sm:$0xff]  ;;  %v289_v53 = vld [vmem:[#allocation11] sm:$0xff]  ;;  %v291_v55 = vld [vmem:[#allocation11 + $0x10] sm:$0xff] }
  0x67   :  { %588 = vmatprep.subr.bf16.mxu0 %v829_v0  ;;  %v627_v54 = vpack.c.bf16 %v292_v52, %v290_v51  ;;  %v294_v56 = vld [vmem:[#allocation11 + $0x28] sm:$0xff]  ;;  %v296_v57 = vld [vmem:[#allocation11 + $0x38] sm:$0xff]  ;;  %v629_v58 = vpack.c.bf16 %v291_v55, %v289_v53  ;;  %v293_v60 = vld [vmem:[#allocation11 + $0x20] sm:$0xff] }
  0x68   :  { %611 = vmatpush3.bf16.msra.mxu1 %v610_v24  ;;  %v631_v59 = vpack.c.bf16 %v296_v57, %v294_v56  ;;  %v295_v61 = vld [vmem:[#allocation11 + $0x30] sm:$0xff]  ;;  %v298_v62 = vld [vmem:[#allocation11 + $0x48] sm:$0xff]  ;;  %v300_v63 = vld [vmem:[#allocation11 + $0x58] sm:$0xff] }
  0x69   :  { %612 = vmatprep.subr.bf16.mxu1 %v829_v0  ;;  %v297_v2 = vld [vmem:[#allocation11 + $0x40] sm:$0xff]  ;;  %v299_v3 = vld [vmem:[#allocation11 + $0x50] sm:$0xff]  ;;  %v302_v4 = vld [vmem:[#allocation11 + $0x68] sm:$0xff] }
  0x6a   :  { %590 = vmatpush3.bf16.msra.mxu0 %v589_v21  ;;  %v304_v5 = vld [vmem:[#allocation11 + $0x78] sm:$0xff]  ;;  %v637_v6 = vpack.c.bf16 %v299_v3, %v297_v2  ;;  %v301_v8 = vld [vmem:[#allocation11 + $0x60] sm:$0xff]  ;;  %v303_v9 = vld [vmem:[#allocation11 + $0x70] sm:$0xff]  ;;  %v448_v3 = vstv %s1000_s0  ;;  %s832_s0 = smov [#allocation12]  }
  0x6b   :  { %591 = vmatprep.subr.bf16.mxu0 %v829_v0  ;;  %v639_v7 = vpack.c.bf16 %v304_v5, %v302_v4  ;;  %v306_v10 = vld [vmem:[#allocation11 + $0x88] sm:$0xff]  ;;  %v308_v11 = vld [vmem:[#allocation11 + $0x98] sm:$0xff]  ;;  %v641_v12 = vpack.c.bf16 %v303_v9, %v301_v8  ;;  %v305_v14 = vld [vmem:[#allocation11 + $0x80] sm:$0xff]  ;;  %s457_s2 = sshll.u32 %s832_s0, 4  ;;  %s458_s2 = int_to_ptr.vmem [resolvable:$true] %s457_s2 }
  0x6c   :  { %614 = vmatpush3.bf16.msra.mxu1 %v613_v30  ;;  %v643_v13 = vpack.c.bf16 %v308_v11, %v306_v10  ;;  %v307_v15 = vld [vmem:[#allocation11 + $0x90] sm:$0xff]  ;;  %v310_v16 = vld [vmem:[#allocation11 + $0xa8] sm:$0xff]  ;;  %v312_v17 = vld [vmem:[#allocation11 + $0xb8] sm:$0xff]  ;;  %s790_s18 = scalar_lea.vmem %s458_s2, 128  ;;  %p795_p13 = scmp.lt.s32.totalorder %s458_s2, %s458_s2 }
  0x6d   :  { %615 = vmatprep.subr.bf16.mxu1 %v829_v0  ;;  %v645_v18 = vpack.c.bf16 %v307_v15, %v305_v14  ;;  %v647_v19 = vpack.c.bf16 %v312_v17, %v310_v16  ;;  %v309_v20 = vld [vmem:[#allocation11 + $0xa0] sm:$0xff]  ;;  %v311_v21 = vld [vmem:[#allocation11 + $0xb0] sm:$0xff]  ;;  %v314_v22 = vld [vmem:[#allocation11 + $0xc8] sm:$0xff]  ;;  %p791_p12 = scmp.ne.s32.totalorder %s458_s2, %s790_s18  ;;  %p796_p0 = scmp.lt.s32.totalorder %s790_s18, %s790_s18 }
  0x6e   :  { %593 = vmatpush3.bf16.msra.mxu0 %v592_v27  ;;  %v316_v23 = vld [vmem:[#allocation11 + $0xd8] sm:$0xff]  ;;  %v649_v24 = vpack.c.bf16 %v311_v21, %v309_v20  ;;  %v313_v26 = vld [vmem:[#allocation11 + $0xc0] sm:$0xff]  ;;  %v315_v27 = vld [vmem:[#allocation11 + $0xd0] sm:$0xff] }
  0x6f   :  { %594 = vmatprep.subr.bf16.mxu0 %v829_v0  ;;  %v651_v25 = vpack.c.bf16 %v316_v23, %v314_v22  ;;  %v653_v28 = vpack.c.bf16 %v315_v27, %v313_v26  ;;  %v472_v29 = vld [vmem:[%s1004_s4] ss:$0 sm:$0xff]  ;;  %v318_v34 = vld [vmem:[#allocation11 + $0xe8] sm:$0xff]  ;;  %v320_v35 = vld [vmem:[#allocation11 + $0xf8] sm:$0xff]  ;;  %p797_p1 = por %p796_p0, %p795_p13 }
  0x70   :  { %617 = vmatpush3.bf16.msra.mxu1 %v616_v36  ;;  %v655_v36 = vpack.c.bf16 %v320_v35, %v318_v34  ;;  %v317_v37 = vld [vmem:[#allocation11 + $0xe0] sm:$0xff]  ;;  %v319_v38 = vld [vmem:[#allocation11 + $0xf0] sm:$0xff] }
  0x71   :  { %618 = vmatprep.subr.bf16.mxu1 %v829_v0  ;;  %v473_v40 = vld [vmem:[%s1006_s6] ss:$0 sm:$0xff]  ;;  %p798_p2 = pnand %p797_p1, %p791_p12 }
  0x72   :  { %596 = vmatpush3.bf16.msra.mxu0 %v595_v33  ;;  %v321_v48 = vld [vmem:[%s1008_s8] sm:$0x3] }
  0x73   :  { %597 = vmatprep.subr.bf16.mxu0 %v829_v0 }
  0x74   :  { %620 = vmatpush3.bf16.msra.mxu1 %v619_v42 }
  0x75   :  { %621 = vmatprep.subr.bf16.mxu1 %v829_v0 }
  0x76   :  { %599 = vmatpush3.bf16.msra.mxu0 %v598_v39  ;;  %v657_v39 = vpack.c.bf16 %v319_v38, %v317_v37 }
  0x77   :  { %600 = vmatprep.subr.bf16.mxu0 %v829_v0 }
  0x78   :  { %623 = vmatpush3.bf16.msra.mxu1 %v622_v46 }
  0x79   :  { %624 = vmatprep.subr.bf16.mxu1 %v829_v0  ;;  %v633_v0 = vpack.c.bf16 %v295_v61, %v293_v60 }
  0x7a   :  { %602 = vmatpush3.bf16.msra.mxu0 %v601_v45  ;;  %v323_v45 = vlaneseq }
  0x7b   :  { %628 = vmatprep.subr.bf16.mxu0 %v627_v54 }
  0x7c   :  { %626 = vmatpush3.bf16.msra.mxu1 %v625_v50  ;;  %v324_v46 = vshrl.u32 %v323_v45, 7  ;;  %v439_v22 = vand.u32 127, %v323_v45 }
  0x7d   :  { %542 = vmatmul.mubr.f32.vlgmr.msra.gmra.mrb[0].mxu0 %v100_v47 }
  0x7e   :  { %397 = vmatprep.mubr.f32.mxu0 %v831_v1  ;;  %630 = vmatpush1.bf16.msra.mxu0 %v629_v58  ;;  %v635_v1 = vpack.c.bf16 %v300_v63, %v298_v62  ;;  %v329_v47 = vsub.s32 1, %v324_v46  ;;  %v325_v56 = vsub.s32 0, %v324_v46  ;;  %vm440_vm3 = vcmp.lt.s32.totalorder %v439_v22, 8 }
  0x7f   :  { %632 = vmatprep.subr.bf16.mxu0 %v631_v59  ;;  %v408_v59 = vld [vmem:[#allocation6] sm:$0xff] }
  0x80   :  { %v330_v49 = vrot.slane %v321_v48, %v329_v47  ;;  %v326_v57 = vrot.slane %v321_v48, %v325_v56  ;;  %v433_v9 = vmul.f32 -0.5, %v408_v59 }
  0x82   :  { %634 = vmatpush1.bf16.msra.mxu0 %v633_v0 }
  0x83   :  { %636 = vmatprep.subr.bf16.mxu0 %v635_v1 }
  0x86   :  { %638 = vmatpush1.bf16.msra.mxu0 %v637_v6 }
  0x87   :  { %640 = vmatprep.subr.bf16.mxu0 %v639_v7 }
  0x8a   :  { %642 = vmatpush1.bf16.msra.mxu0 %v641_v12 }
  0x8b   :  { %644 = vmatprep.subr.bf16.mxu0 %v643_v13  ;;  %v434_v13 = vmul.f32 %v433_v9, %v408_v59 }
  0x8e   :  { %646 = vmatpush1.bf16.msra.mxu0 %v645_v18 }
  0x8f   :  { %648 = vmatprep.subr.bf16.mxu0 %v647_v19 }
  0x92   :  { %650 = vmatpush1.bf16.msra.mxu0 %v649_v24 }
  0x93   :  { %652 = vmatprep.subr.bf16.mxu0 %v651_v25 }
  0x96   :  { %654 = vmatpush1.bf16.msra.mxu0 %v653_v28 }
  0x97   :  { %656 = vmatprep.subr.bf16.mxu0 %v655_v36 }
  0x9a   :  { %658 = vmatpush1.bf16.msra.mxu0 %v657_v39 }
 0x150   :  { %v190_v30 = vpop.f32.mrb[0].mxu0 }
 0x151   :  { %v191_v31 = vadd.f32 %v472_v29, %v190_v30  ;;  %v543_v32 = vpop.f32.mrb[1].mxu0 }
 0x153   :  { %v194_v33 = vmax.f32 %v191_v31, 0.0 }
 0x155   :  { %577 = vmatmul.mubr.f32.vlgmr.msra.gmra.mrb[0].mxu1 %v194_v33 }
 0x228   :  { %v284_v41 = vpop.f32.mrb[0].mxu1 }
 0x229   :  { %v285_v42 = vadd.f32 %v473_v40, %v284_v41  ;;  %v578_v43 = vpop.f32.mrb[1].mxu1 }
 0x22b   :  { %v288_v44 = vmax.f32 %v285_v42, 0.0 }
 0x22d   :  { %398 = vmatmul.mubr.f32.vlgmr.msra.gmra.mrb[2].mxu0 %v288_v44 }
 0x300   :  { %v399_v50 = vpop.f32.mrb[2].mxu0 }
 0x301   :  { %v401_v51 = vpop.f32.mrb[3].mxu0  ;;  %v400_v60 = vadd.f32 %v399_v50, %v326_v57 }
 0x302   :  { %v402_v52 = vadd.f32 %v401_v51, %v330_v49 }
 0x304   :  { %v404_v53 = vmax.f32 %v402_v52, -20.0 }
 0x306   :  { %v405_v54 = vmin.f32 %v404_v53, 2.0 }
 0x308   :  { %v406_v55 = vmul.f32 1.442695, %v405_v54  ;;  %v435_v19 = vsub.f32 %v434_v13, %v405_v54 }
 0x30a   :  { %672 = vpow2.f32 %v406_v55  ;;  %v474_v25 = vadd.f32 -0.9189385, %v435_v19 }
 0x314   :  { %v673_v58 = vpop.eup %672 }
 0x315   :  { %v409_v61 = vmul.f32 %v673_v58, %v408_v59 }
 0x317   :  { %v410_v62 = vadd.f32 %v409_v61, %v400_v60 }
 0x319   :  { %v412_v63 = vmul.f32 -2.0, %v410_v62  ;;  %674 = vtanh.f32 %v410_v62  ;;  %v411_v20 = vsub.f32 0.6931472, %v410_v62 }
 0x31b   :  { %v416_v0 = vand.u32 2147483647, %v412_v63  ;;  %v413_v16 = vmax.f32 %v412_v63, 0.0  ;;  %vm414_vm2 = vcmp.ne.f32.partialorder %v412_v63, %v412_v63 }
 0x31d   :  { %v417_v1 = vsub.f32 0.0, %v416_v0 }
 0x31f   :  { %v418_v2 = vmul.f32 1.442695, %v417_v1 }
 0x321   :  { %676 = vpow2.f32 %v418_v2 }
 0x323   :  { %v675_v4 = vpop.eup %674 }
 0x324   :  { %v449_v5 = vmul.f32 %v675_v4, %v448_v3 }
 0x326   :  { %450 = vst [vmem:[#allocation12] sm:$0xff] %v449_v5 }
 0x32b   :  { %v677_v6 = vpop.eup %676 }
 0x32c   :  { %v420_v7 = vadd.f32 1.0, %v677_v6  ;;  %v423_v8 = vmul.f32 -0.5, %v677_v6  ;;  %v426_v11 = vand.u32 2147483647, %v677_v6 }
 0x32e   :  { %678 = vlog2.f32 %v420_v7  ;;  %v424_v10 = vadd.f32 1.0, %v423_v8  ;;  %vm427_vm1 = vcmp.lt.f32.partialorder %v426_v11, 0.0004427343 }
 0x330   :  { %v425_v15 = vmul.f32 %v677_v6, %v424_v10 }
 0x338   :  { %v679_v12 = vpop.eup %678 }
 0x339   :  { %v422_v14 = vmul.f32 0.6931472, %v679_v12 }
 0x33b   :  { %v428_v17 = vsel %vm427_vm1, %v425_v15, %v422_v14 }
 0x33c   :  { %v429_v18 = vadd.f32 %v428_v17, %v413_v16 }
 0x33e   :  { %v430_v21 = vsel %vm414_vm2, %v412_v63, %v429_v18 }
 0x33f   :  { %v431_v23 = vsub.f32 %v411_v20, %v430_v21 }
 0x341   :  { %v432_v24 = vmul.f32 2.0, %v431_v23 }
 0x343   :  { %v437_v26 = vsub.f32 %v474_v25, %v432_v24 }
 0x345   :  { %v441_v27 = vsel %vm440_vm3, %v437_v26, 0.0 }
 0x346   :  { %442 = vadd.xlane.f32.xlu0 %v441_v27 }
 0x347   :  { %801 = shalt.err (!%p798_p2)
}
 0x348   :  { %s802_s21 = scalar_lea.hbm %s1009_s9, 128 }
 0x349   :  { %p803_p3 = scmp.ne.s32.totalorder %s1009_s9, %s802_s21  ;;  %p806_p4 = scmp.lt.u32.totalorder %s802_s21, %s1009_s9 }
 0x34b   :  { %p808_p5 = pnand %p806_p4, %p803_p3 }
 0x34d   :  { %811 = shalt.err (!%p808_p5)
}
 0x34e   :  { %460 = dma.vmem_to_hbm [thread:$0]  %s458_s2, 128, %s1009_s9, [#allocation5]   ;;  %vm444_vm4 = vcmask 7168  }
 0x3d3   :  { %v443_v28 = vpop.xlane.xlu0 %442 }
 0x3d4   :  { %445 = vst.msk [vmem:[%s1010_s10] sm:$0xff] %vm444_vm4, %v443_v28 }
 0x3d5   :  { %818 = dma.done.wait [#allocation5], 128  }
 0x3d6   :  { %819 = vsyncadd [#allocation5], 4294967168 }
 0x3d7   :  { %468 = vsyncpa [#allocation4], 1 }
 0x3d8   :  { %469 = vsyncpa [#allocation7], 1 }
 0x3d9   :  { %470 = vsyncpa [#allocation10], 1 }
 0x3da   :  { %471 = vsyncpa [#allocation5], 1 }

</bundles_post_ra>
